<compile_context>
chip_gen: v7x
topology: tpu7x:2x2x1
jax: 0.10.0
libtpu: 0.0.40
codegen_flags: <defaults>
</compile_context>

<pallas_src>
import jax
import jax.numpy as jnp
from jax.experimental import pallas as pl
from jax.experimental.pallas import tpu as pltpu

IN_DIM = 4     # env.observation_space.shape[0] for CartPole-v1
HIDDEN = 32
OUT_DIM = 2    # env.action_space.n for CartPole-v1

LANE = 128
# Batch-tile cap.  h/acc is (32, TB) f32 = TB/32 vregs: 64 vregs @ TB=2048
# (full vreg file; any spill goes to a tiny VMEM temp).  VMEM is irrelevant at
# this size on v5e/v6e/v7x, so the cap is chosen for vreg pressure + minimum
# grid-step overhead (~0.35 us/step).
MAX_TB = 2048


def _round_up(n, m):
    return ((n + m - 1) // m) * m


def _cdiv(a, b):
    return -(-a // b)


def dqn_kernel(x_ref, w1_ref, b1_ref, w2_ref, b2_ref, q_ref, act_ref, maxq_ref):
    tb = x_ref.shape[1]                       # batch tile width (lanes), static

    x = x_ref[...]                            # (IN_DIM, tb)
    w1 = w1_ref[...]                          # (HIDDEN, IN_DIM)

    # fc1 on the VPU: accumulator initialised with the bias, K=4 unrolled
    # broadcast multiply-adds (no MXU fill/drain for a 4-deep contraction).
    # (A stride-0 sublane-broadcast load via pl.ds(k, HIDDEN, stride=0) would
    #  move the row replication into the vld slot; kept as VPU broadcast here.)
    acc = jnp.broadcast_to(b1_ref[...], (HIDDEN, tb))            # (HIDDEN, tb)
    for k in range(IN_DIM):
        acc = acc + w1[:, k:k + 1] * x[k:k + 1, :]
    h = jnp.maximum(acc, 0.0)                                     # (HIDDEN, tb)

    # fc2: OUT_DIM rows as VPU multiply + XLU sublane reduction, stacked into a
    # single unmasked (OUT_DIM, tb) store.
    w2 = w2_ref[...]                          # (HIDDEN, OUT_DIM)
    rows = [jnp.sum(w2[:, j:j + 1] * h, axis=0, keepdims=True)    # (1, tb) each
            for j in range(OUT_DIM)]
    q = jnp.concatenate(rows, axis=0) + b2_ref[...]               # (OUT_DIM, tb)
    q_ref[...] = q

    # Fused DQN-step ops: greedy action and max_a Q(s,a), per batch lane.
    # NOTE: zero-padded batch lanes carry garbage Q-values (relu(b1)@w2t + b2);
    # they are sliced off in the wrapper and no batch-axis reduction happens
    # here, so no masking is required.
    best_q = q[0:1, :]
    best_a = jnp.zeros((1, tb), jnp.int32)
    for j in range(1, OUT_DIM):
        better = q[j:j + 1, :] > best_q       # ties -> lower index (argmax-compatible)
        best_a = jnp.where(better, j, best_a)
        best_q = jnp.where(better, q[j:j + 1, :], best_q)
    act_ref[...] = best_a
    maxq_ref[...] = best_q
    # TODO(synk): fuse the TD target (r + gamma * maxq_target) and Huber
    # residual once target-net Q / rewards / dones are plumbed in; padded batch
    # lanes must then be masked before any reduction over the batch axis.


def dqn_apply_fm(x_fm, w1, b1, w2t, b2, *, max_tile=MAX_TB, min_grid_steps=1):
    """Feature-major (transpose-free) entry point.

    x_fm: (IN_DIM, B) float32.  Returns (q_fm (OUT_DIM, B), greedy_action (B,) int32,
    max_q (B,) float32).  Set min_grid_steps=2 on v7x to feed both TensorCores
    for mid-size batches.
    """
    B = x_fm.shape[1]

    # Pad only to a lane multiple, then choose TB covering B_pad in n_steps
    # (avoids the old up-to-a-full-tile padding overshoot).
    B_pad = _round_up(B, LANE)
    n_steps = max(_cdiv(B_pad, max_tile), min_grid_steps)
    n_steps = min(n_steps, B_pad // LANE)      # never create empty tiles
    TB = _round_up(_cdiv(B_pad, n_steps), LANE)
    B_pad = _round_up(B_pad, TB)
    if B_pad != B:
        x_fm = jnp.pad(x_fm, ((0, 0), (0, B_pad - B)))

    grid = (B_pad // TB,)
    q_fm, act, maxq = pl.pallas_call(
        dqn_kernel,
        out_shape=(
            jax.ShapeDtypeStruct((OUT_DIM, B_pad), jnp.float32),
            jax.ShapeDtypeStruct((1, B_pad), jnp.int32),
            jax.ShapeDtypeStruct((1, B_pad), jnp.float32),
        ),
        grid=grid,
        in_specs=[
            pl.BlockSpec((IN_DIM, TB), lambda i: (0, i)),        # x (feature-major)
            pl.BlockSpec((HIDDEN, IN_DIM), lambda i: (0, 0)),    # w1 (resident)
            pl.BlockSpec((HIDDEN, 1), lambda i: (0, 0)),         # b1
            pl.BlockSpec((HIDDEN, OUT_DIM), lambda i: (0, 0)),   # w2t
            pl.BlockSpec((OUT_DIM, 1), lambda i: (0, 0)),        # b2
        ],
        out_specs=(
            pl.BlockSpec((OUT_DIM, TB), lambda i: (0, i)),       # Q values
            pl.BlockSpec((1, TB), lambda i: (0, i)),             # greedy action
            pl.BlockSpec((1, TB), lambda i: (0, i)),             # max-Q
        ),
        compiler_params=pltpu.CompilerParams(
            dimension_semantics=("parallel",)),                  # megacore on v7x
    )(x_fm, w1, b1, w2t, b2)

    return q_fm[:, :B], act[0, :B], maxq[0, :B]


def dqn_forward(x, w1, b1, w2t, b2, *, min_pallas_batch=33):
    """PyTorch-compatible interface: x (B, IN_DIM) -> Q-values (B, OUT_DIM)."""
    B = x.shape[0]
    if B < min_pallas_batch:
        # Tiny acting batches: a fully fused XLA MLP beats pad + transpose +
        # pallas_call launch overhead.  The kernel is for replay batches.
        h = jnp.maximum(x @ w1.T + b1.T, 0.0)
        return h @ w2t + b2.T
    q_fm, _, _ = dqn_apply_fm(x.T, w1, b1, w2t, b2)
    return q_fm.T


def init_params(key):
    # PyTorch nn.Linear default init: U(-1/sqrt(fan_in), 1/sqrt(fan_in)).
    k1, k2, k3, k4 = jax.random.split(key, 4)
    bound1 = 1.0 / jnp.sqrt(jnp.float32(IN_DIM))
    bound2 = 1.0 / jnp.sqrt(jnp.float32(HIDDEN))
    w1 = jax.random.uniform(k1, (HIDDEN, IN_DIM), jnp.float32, -bound1, bound1)
    b1 = jax.random.uniform(k2, (HIDDEN, 1), jnp.float32, -bound1, bound1)
    w2t = jax.random.uniform(k3, (HIDDEN, OUT_DIM), jnp.float32, -bound2, bound2)
    b2 = jax.random.uniform(k4, (OUT_DIM, 1), jnp.float32, -bound2, bound2)
    return w1, b1, w2t, b2


def reference_forward(x, w1, b1, w2t, b2):
    # Matches PyTorch: relu(x @ W1.T + b1) @ W2.T + b2, with W2.T == w2t.
    h = jnp.maximum(x @ w1.T + b1.T, 0.0)
    return h @ w2t + b2.T


if __name__ == "__main__":
    key = jax.random.PRNGKey(0)
    k_params, k_x1, k_x2, k_x3 = jax.random.split(key, 4)
    w1, b1, w2t, b2 = init_params(k_params)

    # 1) Replay minibatch through the feature-major (transpose-free) fused path.
    B1 = 256
    x1 = jax.random.normal(k_x1, (B1, IN_DIM), jnp.float32)
    q_fm, act, maxq = jax.block_until_ready(
        dqn_apply_fm(x1.T, w1, b1, w2t, b2))
    ref1 = reference_forward(x1, w1, b1, w2t, b2)
    assert q_fm.shape == (OUT_DIM, B1)
    assert jnp.allclose(q_fm.T, ref1, atol=1e-5, rtol=1e-5)
    assert jnp.array_equal(act.astype(jnp.int32),
                           jnp.argmax(ref1, axis=1).astype(jnp.int32))
    assert jnp.allclose(maxq, jnp.max(ref1, axis=1), atol=1e-5, rtol=1e-5)

    # 2) Small unaligned batch forced through the kernel (exercises lane padding).
    B2 = 8
    x2 = jax.random.normal(k_x2, (B2, IN_DIM), jnp.float32)
    out2 = jax.block_until_ready(
        dqn_forward(x2, w1, b1, w2t, b2, min_pallas_batch=1))
    ref2 = reference_forward(x2, w1, b1, w2t, b2)
    assert out2.shape == (B2, OUT_DIM)
    assert jnp.allclose(out2, ref2, atol=1e-5, rtol=1e-5)

    # 3) Same tiny batch through the default path (fused-XLA bypass, no Pallas).
    out3 = jax.block_until_ready(dqn_forward(x2, w1, b1, w2t, b2))
    assert jnp.allclose(out3, ref2, atol=1e-5, rtol=1e-5)

    # 4) Odd-sized larger batch that spans two grid steps (overshoot-avoiding
    #    tiling + megacore-style split on v7x).
    B4 = 2176
    x4 = jax.random.normal(k_x3, (B4, IN_DIM), jnp.float32)
    q4, act4, maxq4 = jax.block_until_ready(
        dqn_apply_fm(x4.T, w1, b1, w2t, b2))
    ref4 = reference_forward(x4, w1, b1, w2t, b2)
    assert q4.shape == (OUT_DIM, B4)
    assert jnp.allclose(q4.T, ref4, atol=1e-5, rtol=1e-5)
    assert jnp.array_equal(act4.astype(jnp.int32),
                           jnp.argmax(ref4, axis=1).astype(jnp.int32))

    print("KERNEL_OK")
</pallas_src>

<mosaic_0001>
module attributes {stable_mosaic.version = 11 : i64} {
  func.func @dqn_kernel(%arg0: i32, %arg1: memref<4x256xf32, #tpu.memory_space<vmem>>, %arg2: memref<32x4xf32, #tpu.memory_space<vmem>>, %arg3: memref<32x1xf32, #tpu.memory_space<vmem>>, %arg4: memref<32x2xf32, #tpu.memory_space<vmem>>, %arg5: memref<2x1xf32, #tpu.memory_space<vmem>>, %arg6: memref<2x256xf32, #tpu.memory_space<vmem>>, %arg7: memref<1x256xi32, #tpu.memory_space<vmem>>, %arg8: memref<1x256xf32, #tpu.memory_space<vmem>>) attributes {dimension_semantics = [#tpu.dimension_semantics<parallel>], iteration_bounds = array<i64: 1>, scalar_prefetch = 0 : i64, scratch_operands = 0 : i64, tpu.core_type = #tpu.core_type<tc>, window_params = [{transform_indices = @transform_0, window_bounds = array<i64: 4, 256>}, {pipeline_mode = #tpu.pipeline_mode<synchronous>, transform_indices = @transform_1, window_bounds = array<i64: 32, 4>}, {pipeline_mode = #tpu.pipeline_mode<synchronous>, transform_indices = @transform_2, window_bounds = array<i64: 32, 1>}, {pipeline_mode = #tpu.pipeline_mode<synchronous>, transform_indices = @transform_3, window_bounds = array<i64: 32, 2>}, {pipeline_mode = #tpu.pipeline_mode<synchronous>, transform_indices = @transform_4, window_bounds = array<i64: 2, 1>}, {transform_indices = @transform_5, window_bounds = array<i64: 2, 256>}, {transform_indices = @transform_6, window_bounds = array<i64: 1, 256>}, {transform_indices = @transform_7, window_bounds = array<i64: 1, 256>}]} {
    %c0 = arith.constant 0 : index
    %c0_0 = arith.constant 0 : index
    %0 = vector.load %arg1[%c0, %c0_0] : memref<4x256xf32, #tpu.memory_space<vmem>>, vector<4x256xf32>
    %c0_1 = arith.constant 0 : index
    %c0_2 = arith.constant 0 : index
    %1 = vector.load %arg2[%c0_1, %c0_2] : memref<32x4xf32, #tpu.memory_space<vmem>>, vector<32x4xf32>
    %c0_3 = arith.constant 0 : index
    %c0_4 = arith.constant 0 : index
    %2 = vector.load %arg3[%c0_3, %c0_4] : memref<32x1xf32, #tpu.memory_space<vmem>>, vector<32x1xf32>
    %3 = vector.shape_cast %2 : vector<32x1xf32> to vector<32x1xf32>
    %4 = vector.broadcast %3 : vector<32x1xf32> to vector<32x256xf32>
    %5 = vector.extract_strided_slice %1 {offsets = [0, 0], sizes = [32, 1], strides = [1, 1]} : vector<32x4xf32> to vector<32x1xf32>
    %6 = vector.extract_strided_slice %0 {offsets = [0, 0], sizes = [1, 256], strides = [1, 1]} : vector<4x256xf32> to vector<1x256xf32>
    %7 = vector.broadcast %5 : vector<32x1xf32> to vector<32x256xf32>
    %8 = vector.broadcast %6 : vector<1x256xf32> to vector<32x256xf32>
    %9 = arith.mulf %7, %8 : vector<32x256xf32>
    %10 = arith.addf %4, %9 : vector<32x256xf32>
    %11 = vector.extract_strided_slice %1 {offsets = [0, 1], sizes = [32, 1], strides = [1, 1]} : vector<32x4xf32> to vector<32x1xf32>
    %12 = vector.extract_strided_slice %0 {offsets = [1, 0], sizes = [1, 256], strides = [1, 1]} : vector<4x256xf32> to vector<1x256xf32>
    %13 = vector.broadcast %11 : vector<32x1xf32> to vector<32x256xf32>
    %14 = vector.broadcast %12 : vector<1x256xf32> to vector<32x256xf32>
    %15 = arith.mulf %13, %14 : vector<32x256xf32>
    %16 = arith.addf %10, %15 : vector<32x256xf32>
    %17 = vector.extract_strided_slice %1 {offsets = [0, 2], sizes = [32, 1], strides = [1, 1]} : vector<32x4xf32> to vector<32x1xf32>
    %18 = vector.extract_strided_slice %0 {offsets = [2, 0], sizes = [1, 256], strides = [1, 1]} : vector<4x256xf32> to vector<1x256xf32>
    %19 = vector.broadcast %17 : vector<32x1xf32> to vector<32x256xf32>
    %20 = vector.broadcast %18 : vector<1x256xf32> to vector<32x256xf32>
    %21 = arith.mulf %19, %20 : vector<32x256xf32>
    %22 = arith.addf %16, %21 : vector<32x256xf32>
    %23 = vector.extract_strided_slice %1 {offsets = [0, 3], sizes = [32, 1], strides = [1, 1]} : vector<32x4xf32> to vector<32x1xf32>
    %24 = vector.extract_strided_slice %0 {offsets = [3, 0], sizes = [1, 256], strides = [1, 1]} : vector<4x256xf32> to vector<1x256xf32>
    %25 = vector.broadcast %23 : vector<32x1xf32> to vector<32x256xf32>
    %26 = vector.broadcast %24 : vector<1x256xf32> to vector<32x256xf32>
    %27 = arith.mulf %25, %26 : vector<32x256xf32>
    %28 = arith.addf %22, %27 : vector<32x256xf32>
    %cst = arith.constant 0.000000e+00 : f32
    %29 = vector.broadcast %cst : f32 to vector<32x256xf32>
    %30 = arith.maximumf %28, %29 : vector<32x256xf32>
    %c0_5 = arith.constant 0 : index
    %c0_6 = arith.constant 0 : index
    %31 = vector.load %arg4[%c0_5, %c0_6] : memref<32x2xf32, #tpu.memory_space<vmem>>, vector<32x2xf32>
    %32 = vector.extract_strided_slice %31 {offsets = [0, 0], sizes = [32, 1], strides = [1, 1]} : vector<32x2xf32> to vector<32x1xf32>
    %33 = vector.broadcast %32 : vector<32x1xf32> to vector<32x256xf32>
    %34 = arith.mulf %33, %30 : vector<32x256xf32>
    %cst_7 = arith.constant dense<0.000000e+00> : vector<256xf32>
    %35 = vector.multi_reduction <add>, %34, %cst_7 [0] : vector<32x256xf32> to vector<256xf32>
    %36 = vector.shape_cast %35 : vector<256xf32> to vector<1x256xf32>
    %37 = vector.extract_strided_slice %31 {offsets = [0, 1], sizes = [32, 1], strides = [1, 1]} : vector<32x2xf32> to vector<32x1xf32>
    %38 = vector.broadcast %37 : vector<32x1xf32> to vector<32x256xf32>
    %39 = arith.mulf %38, %30 : vector<32x256xf32>
    %cst_8 = arith.constant dense<0.000000e+00> : vector<256xf32>
    %40 = vector.multi_reduction <add>, %39, %cst_8 [0] : vector<32x256xf32> to vector<256xf32>
    %41 = vector.shape_cast %40 : vector<256xf32> to vector<1x256xf32>
    %42 = tpu.concatenate %36, %41 in 0 : vector<1x256xf32>, vector<1x256xf32> -> vector<2x256xf32>
    %c0_9 = arith.constant 0 : index
    %c0_10 = arith.constant 0 : index
    %43 = vector.load %arg5[%c0_9, %c0_10] : memref<2x1xf32, #tpu.memory_space<vmem>>, vector<2x1xf32>
    %44 = vector.broadcast %43 : vector<2x1xf32> to vector<2x256xf32>
    %45 = arith.addf %42, %44 : vector<2x256xf32>
    %c0_11 = arith.constant 0 : index
    %c0_12 = arith.constant 0 : index
    %46 = vector.load %arg6[%c0_11, %c0_12] : memref<2x256xf32, #tpu.memory_space<vmem>>, vector<2x256xf32>
    tpu.vector_store %arg6[%c0_11, %c0_12], %45 {strides = array<i32>} : memref<2x256xf32, #tpu.memory_space<vmem>>, vector<2x256xf32>,
    %47 = vector.extract_strided_slice %45 {offsets = [0, 0], sizes = [1, 256], strides = [1, 1]} : vector<2x256xf32> to vector<1x256xf32>
    %c0_i32 = arith.constant 0 : i32
    %48 = vector.broadcast %c0_i32 : i32 to vector<1x256xi32>
    %49 = vector.extract_strided_slice %45 {offsets = [1, 0], sizes = [1, 256], strides = [1, 1]} : vector<2x256xf32> to vector<1x256xf32>
    %50 = arith.cmpf ogt, %49, %47 : vector<1x256xf32>
    %c1_i32 = arith.constant 1 : i32
    %51 = vector.broadcast %c1_i32 : i32 to vector<1x256xi32>
    %52 = arith.select %50, %51, %48 : vector<1x256xi1>, vector<1x256xi32>
    %53 = vector.extract_strided_slice %45 {offsets = [1, 0], sizes = [1, 256], strides = [1, 1]} : vector<2x256xf32> to vector<1x256xf32>
    %54 = arith.select %50, %53, %47 : vector<1x256xi1>, vector<1x256xf32>
    %c0_13 = arith.constant 0 : index
    %c0_14 = arith.constant 0 : index
    %55 = vector.load %arg7[%c0_13, %c0_14] : memref<1x256xi32, #tpu.memory_space<vmem>>, vector<1x256xi32>
    tpu.vector_store %arg7[%c0_13, %c0_14], %52 {strides = array<i32>} : memref<1x256xi32, #tpu.memory_space<vmem>>, vector<1x256xi32>,
    %c0_15 = arith.constant 0 : index
    %c0_16 = arith.constant 0 : index
    %56 = vector.load %arg8[%c0_15, %c0_16] : memref<1x256xf32, #tpu.memory_space<vmem>>, vector<1x256xf32>
    tpu.vector_store %arg8[%c0_15, %c0_16], %54 {strides = array<i32>} : memref<1x256xf32, #tpu.memory_space<vmem>>, vector<1x256xf32>,
    return
  }
  func.func @transform_0(%arg0: i32) -> (i32, i32) {
    %c0_i32 = arith.constant 0 : i32
    %c0_i32_0 = arith.constant 0 : i32
    return %c0_i32, %arg0 : i32, i32
  }
  func.func @transform_1(%arg0: i32) -> (i32, i32) {
    %c0_i32 = arith.constant 0 : i32
    %c0_i32_0 = arith.constant 0 : i32
    %c0_i32_1 = arith.constant 0 : i32
    return %c0_i32, %c0_i32_0 : i32, i32
  }
  func.func @transform_2(%arg0: i32) -> (i32, i32) {
    %c0_i32 = arith.constant 0 : i32
    %c0_i32_0 = arith.constant 0 : i32
    %c0_i32_1 = arith.constant 0 : i32
    return %c0_i32, %c0_i32_0 : i32, i32
  }
  func.func @transform_3(%arg0: i32) -> (i32, i32) {
    %c0_i32 = arith.constant 0 : i32
    %c0_i32_0 = arith.constant 0 : i32
    %c0_i32_1 = arith.constant 0 : i32
    return %c0_i32, %c0_i32_0 : i32, i32
  }
  func.func @transform_4(%arg0: i32) -> (i32, i32) {
    %c0_i32 = arith.constant 0 : i32
    %c0_i32_0 = arith.constant 0 : i32
    %c0_i32_1 = arith.constant 0 : i32
    return %c0_i32, %c0_i32_0 : i32, i32
  }
  func.func @transform_5(%arg0: i32) -> (i32, i32) {
    %c0_i32 = arith.constant 0 : i32
    %c0_i32_0 = arith.constant 0 : i32
    return %c0_i32, %arg0 : i32, i32
  }
  func.func @transform_6(%arg0: i32) -> (i32, i32) {
    %c0_i32 = arith.constant 0 : i32
    %c0_i32_0 = arith.constant 0 : i32
    return %c0_i32, %arg0 : i32, i32
  }
  func.func @transform_7(%arg0: i32) -> (i32, i32) {
    %c0_i32 = arith.constant 0 : i32
    %c0_i32_0 = arith.constant 0 : i32
    return %c0_i32, %arg0 : i32, i32
  }
}

</mosaic_0001>

<bundles_post_ra>
// kernel: tpu_custom_call.1
= control target key start
LH: loop header
LB: loop body
LE: loop exit
PB: predicated region body
PF: predicated region fallthrough
CT: control target
= control target key end

     0   :  { %13 = vsyncpa [#allocation3], 0  ;;  %v569_v2 = vmov 0   ;;  %s732_s0 = inlined_call_operand.vmem [shape: f32[4,256], index: 0, kind: input, shape index: {}]   ;;  %s733_s1 = inlined_call_operand.vmem [shape: f32[32,4], index: 1, kind: input, shape index: {}]   ;;  %s734_s2 = inlined_call_operand.vmem [shape: f32[32,1], index: 2, kind: input, shape index: {}]   ;;  %s735_s3 = inlined_call_operand.vmem [shape: f32[32,2], index: 3, kind: input, shape index: {}]   ;;  %s736_s4 = inlined_call_operand.vmem [shape: f32[2,1], index: 4, kind: input, shape index: {}]   ;;  %s737_s5 = inlined_call_operand.hbm [shape: f32[2,256], index: 5, kind: output, shape index: {0}]   ;;  %s738_s6 = inlined_call_operand.hbm [shape: s32[1,256], index: 6, kind: output, shape index: {1}]   ;;  %s739_s7 = inlined_call_operand.hbm [shape: f32[1,256], index: 7, kind: output, shape index: {2}]  }
   0x1   :  { %v30_v0 = vld [vmem:[%s734_s2] sm:$0xff]  ;;  %484 = vset.pattern.permute.xlu1 %v569_v2  ;;  %483 = vset.pattern.permute.xlu0 %v569_v2  ;;  %v31_v3 = vld [vmem:[%s734_s2 + $0x8] sm:$0xff] }
   0x2   :  { %v26_v1 = vld [vmem:[%s733_s1] sm:$0xff]  ;;  %36 = vperm.xlu1 %484, %v30_v0   ;;  %v27_v4 = vld [vmem:[%s733_s1 + $0x8] sm:$0xff] }
   0x3   :  { %56 = vperm.xlu0 %483, %v26_v1  }
   0x4   :  { %14 = vsyncpa [#allocation5], 0  ;;  %v28_v5 = vld [vmem:[%s733_s1 + $0x10] sm:$0xff]  ;;  %v570_v6 = vmov 1   ;;  %v29_v8 = vld [vmem:[%s733_s1 + $0x18] sm:$0xff]  ;;  %v571_v9 = vmov 2   ;;  %v75_v23 = vlaneseq }
   0x5   :  { %v32_v7 = vld [vmem:[%s734_s2 + $0x10] sm:$0xff]  ;;  %v33_v10 = vld [vmem:[%s734_s2 + $0x18] sm:$0xff]  ;;  %v572_v11 = vmov 3   ;;  %v268_v12 = vld [vmem:[%s735_s3 + $0x8] sm:$0xff]  ;;  %vm359_vm0 = vcmask 1040384  }
   0x6   :  { %41 = vperm.xlu1 %484, %v31_v3   ;;  %v269_v13 = vld [vmem:[%s735_s3 + $0x10] sm:$0xff]  ;;  %v270_v14 = vld [vmem:[%s735_s3 + $0x18] sm:$0xff]  ;;  %v362_v15 = vld [vmem:[%s736_s4] sm:$0x3]  ;;  %v663_v26 = vshrl.u32 %v75_v23, 7 }
   0x7   :  { %61 = vperm.xlu0 %483, %v27_v4   ;;  %v267_v16 = vld [vmem:[%s735_s3] sm:$0xff] }
   0x8   :  { %v77_v29 = vsub.s32 0, %v663_v26  ;;  %v81_v30 = vsub.s32 4, %v663_v26  ;;  %v25_v31 = vld [vmem:[%s732_s0] sm:$0xff]  ;;  %v127_v33 = vsub.s32 1, %v663_v26  ;;  %v131_v34 = vsub.s32 5, %v663_v26  ;;  %s574_s0 = smov [#allocation2]  }
   0x9   :  { %v177_v40 = vsub.s32 2, %v663_v26  ;;  %v181_v41 = vsub.s32 6, %v663_v26  ;;  %v227_v46 = vsub.s32 3, %v663_v26  ;;  %v231_v47 = vsub.s32 7, %v663_v26  ;;  %s439_s25 = sshll.u32 %s574_s0, 4  ;;  %s440_s25 = int_to_ptr.vmem [resolvable:$true] %s439_s25 }
   0xa   :  { %485 = vset.pattern.permute.xlu1 %v570_v6  ;;  %v78_v36 = vrot.slane %v25_v31, %v77_v29  ;;  %v82_v37 = vrot.slane %v25_v31, %v81_v30  ;;  %v128_v38 = vrot.slane %v25_v31, %v127_v33  ;;  %v132_v39 = vrot.slane %v25_v31, %v131_v34  ;;  %s499_s26 = scalar_lea.vmem %s440_s25, 64  ;;  %p504_p1 = scmp.lt.s32.totalorder %s440_s25, %s440_s25 }
   0xb   :  { %66 = vperm.xlu0 %483, %v28_v5   ;;  %110 = vperm.xlu1 %485, %v26_v1   ;;  %v178_v50 = vrot.slane %v25_v31, %v177_v40  ;;  %v182_v51 = vrot.slane %v25_v31, %v181_v41  ;;  %v228_v58 = vrot.slane %v25_v31, %v227_v46  ;;  %p500_p0 = scmp.ne.s32.totalorder %s440_s25, %s499_s26  ;;  %p505_p2 = scmp.lt.s32.totalorder %s499_s26, %s499_s26 }
   0xc   :  { %v88_v44 = vrot.slane %v78_v36, %v77_v29  ;;  %v92_v45 = vrot.slane %v82_v37, %v77_v29  ;;  %v138_v48 = vrot.slane %v128_v38, %v127_v33  ;;  %v142_v49 = vrot.slane %v132_v39, %v127_v33 }
   0xd   :  { %v232_v59 = vrot.slane %v25_v31, %v231_v47  ;;  %v188_v3 = vrot.slane %v178_v50, %v177_v40  ;;  %p506_p3 = por %p505_p2, %p504_p1 }
   0xf   :  { %486 = vset.pattern.permute.xlu0 %v570_v6  ;;  %487 = vset.pattern.permute.xlu1 %v569_v2  ;;  %p507_p4 = pnand %p506_p3, %p500_p0 }
  0x10   :  { %114 = vperm.xlu0 %486, %v27_v4   ;;  %46 = vperm.xlu1 %487, %v32_v7  }
  0x14   :  { %118 = vperm.xlu0 %486, %v28_v5   ;;  %71 = vperm.xlu1 %487, %v29_v8  }
  0x18   :  { %489 = vset.pattern.permute.xlu0 %v571_v9  ;;  %488 = vset.pattern.permute.xlu1 %v571_v9 }
  0x19   :  { %164 = vperm.xlu0 %489, %v27_v4   ;;  %160 = vperm.xlu1 %488, %v26_v1  }
  0x1d   :  { %168 = vperm.xlu0 %489, %v28_v5   ;;  %490 = vset.pattern.permute.xlu1 %v569_v2 }
  0x1e   :  { %51 = vperm.xlu1 %490, %v33_v10  }
  0x21   :  { %493 = vset.pattern.permute.xlu0 %v572_v11 }
  0x22   :  { %214 = vperm.xlu0 %493, %v27_v4   ;;  %491 = vset.pattern.permute.xlu1 %v570_v6  ;;  %v192_v4 = vrot.slane %v182_v51, %v177_v40 }
  0x23   :  { %122 = vperm.xlu1 %491, %v29_v8  }
  0x26   :  { %222 = vperm.xlu0 %493, %v29_v8  }
  0x27   :  { %492 = vset.pattern.permute.xlu1 %v572_v11 }
  0x28   :  { %210 = vperm.xlu1 %492, %v26_v1  }
  0x2a   :  { %497 = vset.pattern.permute.xlu0 %v569_v2 }
  0x2b   :  { %278 = vperm.xlu0 %497, %v268_v12  }
  0x2c   :  { %494 = vset.pattern.permute.xlu1 %v571_v9 }
  0x2d   :  { %172 = vperm.xlu1 %494, %v29_v8  }
  0x2f   :  { %283 = vperm.xlu0 %497, %v269_v13  }
  0x31   :  { %495 = vset.pattern.permute.xlu1 %v572_v11  ;;  %v238_v11 = vrot.slane %v228_v58, %v227_v46 }
  0x32   :  { %218 = vperm.xlu1 %495, %v28_v5  }
  0x33   :  { %288 = vperm.xlu0 %497, %v270_v14  }
  0x36   :  { %496 = vset.pattern.permute.xlu1 %v569_v2 }
  0x37   :  { %365 = vperm.xlu0 %497, %v362_v15   ;;  %273 = vperm.xlu1 %496, %v267_v16  }
  0x3b   :  { %498 = vset.pattern.permute.xlu1 %v570_v6 }
  0x3c   :  { %318 = vperm.xlu1 %498, %v267_v16  }
  0x40   :  { %322 = vperm.xlu1 %498, %v268_v12   ;;  %v242_v12 = vrot.slane %v232_v59, %v227_v46 }
  0x44   :  { %326 = vperm.xlu1 %498, %v269_v13  }
  0x48   :  { %330 = vperm.xlu1 %498, %v270_v14  }
  0x81   :  { %v37_v17 = vpop.permute.xlu1 %36 }
  0x82   :  { %v57_v18 = vpop.permute.xlu0 %56 }
  0x83   :  { %v93_v52 = vmul.f32 %v88_v44, %v57_v18  ;;  %v94_v53 = vmul.f32 %v92_v45, %v57_v18 }
  0x85   :  { %v42_v19 = vpop.permute.xlu1 %41  ;;  %v101_v5 = vadd.f32 %v93_v52, %v37_v17  ;;  %v102_v6 = vadd.f32 %v94_v53, %v37_v17 }
  0x86   :  { %v62_v20 = vpop.permute.xlu0 %61 }
  0x87   :  { %v95_v55 = vmul.f32 %v88_v44, %v62_v20  ;;  %v96_v56 = vmul.f32 %v92_v45, %v62_v20 }
  0x89   :  { %v103_v9 = vadd.f32 %v95_v55, %v42_v19  ;;  %v104_v10 = vadd.f32 %v96_v56, %v42_v19 }
  0x8a   :  { %v67_v21 = vpop.permute.xlu0 %66  ;;  %v111_v22 = vpop.permute.xlu1 %110 }
  0x8b   :  { %v143_v60 = vmul.f32 %v138_v48, %v111_v22  ;;  %v144_v61 = vmul.f32 %v142_v49, %v111_v22  ;;  %v97_v62 = vmul.f32 %v88_v44, %v67_v21  ;;  %v98_v63 = vmul.f32 %v92_v45, %v67_v21 }
  0x8d   :  { %v151_v14 = vadd.f32 %v143_v60, %v101_v5  ;;  %v152_v15 = vadd.f32 %v144_v61, %v102_v6 }
  0x8f   :  { %v115_v24 = vpop.permute.xlu0 %114  ;;  %v47_v25 = vpop.permute.xlu1 %46 }
  0x90   :  { %v145_v0 = vmul.f32 %v138_v48, %v115_v24  ;;  %v146_v1 = vmul.f32 %v142_v49, %v115_v24  ;;  %v105_v16 = vadd.f32 %v97_v62, %v47_v25  ;;  %v106_v18 = vadd.f32 %v98_v63, %v47_v25 }
  0x92   :  { %v153_v20 = vadd.f32 %v145_v0, %v103_v9  ;;  %v154_v22 = vadd.f32 %v146_v1, %v104_v10 }
  0x93   :  { %v119_v27 = vpop.permute.xlu0 %118  ;;  %v72_v28 = vpop.permute.xlu1 %71 }
  0x94   :  { %v147_v7 = vmul.f32 %v138_v48, %v119_v27  ;;  %v148_v8 = vmul.f32 %v142_v49, %v119_v27  ;;  %v99_v21 = vmul.f32 %v88_v44, %v72_v28  ;;  %v100_v29 = vmul.f32 %v92_v45, %v72_v28 }
  0x96   :  { %v155_v30 = vadd.f32 %v147_v7, %v105_v16  ;;  %v156_v31 = vadd.f32 %v148_v8, %v106_v18 }
  0x98   :  { %v165_v32 = vpop.permute.xlu0 %164  ;;  %v161_v35 = vpop.permute.xlu1 %160 }
  0x99   :  { %v195_v34 = vmul.f32 %v188_v3, %v165_v32  ;;  %v196_v27 = vmul.f32 %v192_v4, %v165_v32  ;;  %v193_v36 = vmul.f32 %v188_v3, %v161_v35  ;;  %v194_v19 = vmul.f32 %v192_v4, %v161_v35 }
  0x9b   :  { %v203_v52 = vadd.f32 %v195_v34, %v153_v20  ;;  %v202_v53 = vadd.f32 %v194_v19, %v152_v15 }
  0x9c   :  { %v169_v42 = vpop.permute.xlu0 %168 }
  0x9d   :  { %v52_v43 = vpop.permute.xlu1 %51  ;;  %v197_v44 = vmul.f32 %v188_v3, %v169_v42  ;;  %v198_v28 = vmul.f32 %v192_v4, %v169_v42 }
  0x9e   :  { %v107_v37 = vadd.f32 %v99_v21, %v52_v43  ;;  %v108_v38 = vadd.f32 %v100_v29, %v52_v43 }
  0x9f   :  { %v205_v61 = vadd.f32 %v197_v44, %v155_v30  ;;  %v206_v62 = vadd.f32 %v198_v28, %v156_v31 }
  0xa1   :  { %v215_v57 = vpop.permute.xlu0 %214 }
  0xa2   :  { %v123_v54 = vpop.permute.xlu1 %122  ;;  %v245_v39 = vmul.f32 %v238_v11, %v215_v57  ;;  %v246_v40 = vmul.f32 %v242_v12, %v215_v57 }
  0xa3   :  { %v149_v33 = vmul.f32 %v138_v48, %v123_v54  ;;  %v150_v17 = vmul.f32 %v142_v49, %v123_v54  ;;  %v204_v48 = vadd.f32 %v196_v27, %v154_v22  ;;  %v201_v49 = vadd.f32 %v193_v36, %v151_v14 }
  0xa4   :  { %v253_v56 = vadd.f32 %v245_v39, %v203_v52 }
  0xa5   :  { %v223_v24 = vpop.permute.xlu0 %222  ;;  %v157_v45 = vadd.f32 %v149_v33, %v107_v37  ;;  %v158_v51 = vadd.f32 %v150_v17, %v108_v38  ;;  %v254_v57 = vadd.f32 %v246_v40, %v204_v48 }
  0xa6   :  { %v249_v54 = vmul.f32 %v238_v11, %v223_v24  ;;  %v250_v35 = vmul.f32 %v242_v12, %v223_v24  ;;  %v261_v6 = vmax.f32 %v253_v56, 0.0 }
  0xa7   :  { %v211_v13 = vpop.permute.xlu1 %210  ;;  %v262_v7 = vmax.f32 %v254_v57, 0.0 }
  0xa8   :  { %v243_v46 = vmul.f32 %v238_v11, %v211_v13  ;;  %v244_v25 = vmul.f32 %v242_v12, %v211_v13 }
  0xaa   :  { %v279_v32 = vpop.permute.xlu0 %278  ;;  %v251_v58 = vadd.f32 %v243_v46, %v201_v49  ;;  %v252_v59 = vadd.f32 %v244_v25, %v202_v53 }
  0xab   :  { %v293_v15 = vmul.f32 %v279_v32, %v261_v6  ;;  %v294_v16 = vmul.f32 %v279_v32, %v262_v7 }
  0xac   :  { %v173_v41 = vpop.permute.xlu1 %172  ;;  %v259_v8 = vmax.f32 %v251_v58, 0.0  ;;  %v260_v9 = vmax.f32 %v252_v59, 0.0 }
  0xad   :  { %v199_v47 = vmul.f32 %v188_v3, %v173_v41  ;;  %v200_v50 = vmul.f32 %v192_v4, %v173_v41 }
  0xae   :  { %v284_v0 = vpop.permute.xlu0 %283 }
  0xaf   :  { %v207_v55 = vadd.f32 %v199_v47, %v157_v45  ;;  %v208_v43 = vadd.f32 %v200_v50, %v158_v51 }
  0xb1   :  { %v219_v60 = vpop.permute.xlu1 %218  ;;  %v257_v4 = vadd.f32 %v249_v54, %v207_v55  ;;  %v258_v5 = vadd.f32 %v250_v35, %v208_v43 }
  0xb2   :  { %v247_v63 = vmul.f32 %v238_v11, %v219_v60  ;;  %v248_v42 = vmul.f32 %v242_v12, %v219_v60  ;;  %v289_v29 = vpop.permute.xlu0 %288 }
  0xb3   :  { %v265_v22 = vmax.f32 %v257_v4, 0.0  ;;  %v266_v21 = vmax.f32 %v258_v5, 0.0 }
  0xb4   :  { %v255_v1 = vadd.f32 %v247_v63, %v205_v61  ;;  %v256_v3 = vadd.f32 %v248_v42, %v206_v62 }
  0xb5   :  { %v297_v34 = vmul.f32 %v289_v29, %v265_v22  ;;  %v298_v27 = vmul.f32 %v289_v29, %v266_v21 }
  0xb6   :  { %v274_v10 = vpop.permute.xlu1 %273  ;;  %v263_v13 = vmax.f32 %v255_v1, 0.0  ;;  %v264_v14 = vmax.f32 %v256_v3, 0.0 }
  0xb7   :  { %v291_v18 = vmul.f32 %v274_v10, %v259_v8  ;;  %v292_v20 = vmul.f32 %v274_v10, %v260_v9 }
  0xb8   :  { %v295_v11 = vmul.f32 %v284_v0, %v263_v13  ;;  %v296_v12 = vmul.f32 %v284_v0, %v264_v14 }
  0xb9   :  { %v299_v24 = vadd.f32 %v293_v15, %v291_v18  ;;  %v308_v30 = vadd.f32 %v294_v16, %v292_v20  ;;  %v366_v15 = vpop.permute.xlu0 %365 }
  0xbb   :  { %v319_v31 = vpop.permute.xlu1 %318  ;;  %v300_v33 = vadd.f32 %v299_v24, %v295_v11  ;;  %v309_v17 = vadd.f32 %v308_v30, %v296_v12 }
  0xbc   :  { %v333_v25 = vmul.f32 %v319_v31, %v259_v8  ;;  %v334_v47 = vmul.f32 %v319_v31, %v260_v9 }
  0xbd   :  { %v301_v36 = vadd.f32 %v300_v33, %v297_v34  ;;  %v310_v19 = vadd.f32 %v309_v17, %v298_v27 }
  0xbf   :  { %v323_v37 = vpop.permute.xlu1 %322  ;;  %v302_v40 = vrot.slane %v301_v36, 4  ;;  %v311_v41 = vrot.slane %v310_v19, 4 }
  0xc0   :  { %v335_v38 = vmul.f32 %v323_v37, %v261_v6  ;;  %v336_v39 = vmul.f32 %v323_v37, %v262_v7  ;;  %v573_v7 = vmov 1966171168  }
  0xc1   :  { %v303_v51 = vadd.f32 %v302_v40, %v301_v36  ;;  %v312_v52 = vadd.f32 %v311_v41, %v310_v19  ;;  %v394_v8 = vunpack.c.l.s4 %v573_v7 }
  0xc2   :  { %v341_v28 = vadd.f32 %v335_v38, %v333_v25  ;;  %v350_v45 = vadd.f32 %v336_v39, %v334_v47 }
  0xc3   :  { %v327_v46 = vpop.permute.xlu1 %326  ;;  %v304_v35 = vrot.slane %v303_v51, 2  ;;  %v313_v55 = vrot.slane %v312_v52, 2 }
  0xc4   :  { %v337_v50 = vmul.f32 %v327_v46, %v263_v13  ;;  %v338_v44 = vmul.f32 %v327_v46, %v264_v14 }
  0xc5   :  { %v305_v59 = vadd.f32 %v304_v35, %v303_v51  ;;  %v314_v60 = vadd.f32 %v313_v55, %v312_v52 }
  0xc6   :  { %v342_v49 = vadd.f32 %v341_v28, %v337_v50  ;;  %v351_v53 = vadd.f32 %v350_v45, %v338_v44 }
  0xc7   :  { %v331_v48 = vpop.permute.xlu1 %330  ;;  %v306_v0 = vrot.slane %v305_v59, 1  ;;  %v315_v1 = vrot.slane %v314_v60, 1 }
  0xc8   :  { %v339_v32 = vmul.f32 %v331_v48, %v265_v22  ;;  %v340_v54 = vmul.f32 %v331_v48, %v266_v21  ;;  %v395_v21 = vunpack.c.0.s8 %v394_v8 }
  0xc9   :  { %v307_v9 = vadd.f32 %v306_v0, %v305_v59  ;;  %v316_v10 = vadd.f32 %v315_v1, %v314_v60 }
  0xca   :  { %v343_v43 = vadd.f32 %v342_v49, %v339_v32  ;;  %v352_v56 = vadd.f32 %v351_v53, %v340_v54  ;;  %v398_v31 = vsub.s32 %v395_v21, %v663_v26 }
  0xcc   :  { %v344_v57 = vrot.slane %v343_v43, 4  ;;  %v353_v58 = vrot.slane %v352_v56, 4 }
  0xce   :  { %v345_v61 = vadd.f32 %v344_v57, %v343_v43  ;;  %v354_v62 = vadd.f32 %v353_v58, %v352_v56 }
  0xd0   :  { %v346_v63 = vrot.slane %v345_v61, 2  ;;  %v355_v42 = vrot.slane %v354_v62, 2 }
  0xd2   :  { %v347_v3 = vadd.f32 %v346_v63, %v345_v61  ;;  %v356_v4 = vadd.f32 %v355_v42, %v354_v62 }
  0xd4   :  { %v348_v5 = vrot.slane %v347_v3, 1  ;;  %v357_v6 = vrot.slane %v356_v4, 1 }
  0xd6   :  { %v349_v13 = vadd.f32 %v348_v5, %v347_v3  ;;  %v358_v14 = vadd.f32 %v357_v6, %v356_v4 }
  0xd8   :  { %v360_v16 = vsel %vm359_vm0, %v307_v9, %v349_v13  ;;  %v361_v18 = vsel %vm359_vm0, %v316_v10, %v358_v14 }
  0xd9   :  { %v368_v20 = vadd.f32 %v366_v15, %v360_v16  ;;  %v369_v22 = vadd.f32 %v366_v15, %v361_v18 }
  0xdb   :  { %v382_v11 = vrot.slane %v368_v20, 7  ;;  %v383_v12 = vrot.slane %v369_v22, 7  ;;  %v372_v29 = vcombine.low %v368_v20, %v369_v22 }
  0xdd   :  { %vm676_vm1 = vcmp.gt.f32.partialorder %v368_v20, %v382_v11  ;;  %vm680_vm2 = vcmp.gt.f32.partialorder %v369_v22, %v383_v12  ;;  %474 = vst.sshfl [vmem:[#allocation2] sm:$0x33 pattern:$0x76325410] %v372_v29 }
  0xde   :  { %v388_v33 = vsel %vm676_vm1, 1, %v569_v2  ;;  %v389_v17 = vsel %vm680_vm2, 1, %v569_v2 }
  0xdf   :  { %510 = shalt.err (!%p507_p4)
}
  0xe0   :  { %s511_s29 = scalar_lea.hbm %s737_s5, 64 }
  0xe1   :  { %p512_p5 = scmp.ne.s32.totalorder %s737_s5, %s511_s29  ;;  %p515_p6 = scmp.lt.u32.totalorder %s511_s29, %s737_s5 }
  0xe3   :  { %p517_p7 = pnand %p515_p6, %p512_p5 }
  0xe5   :  { %520 = shalt.err (!%p517_p7)
}
  0xe6   :  { %442 = dma.vmem_to_hbm [thread:$0]  %s440_s25, 64, %s737_s5, [#allocation3]   ;;  %v390_v2 = vsel %vm676_vm1, %v368_v20, %v382_v11  ;;  %v391_v26 = vsel %vm680_vm2, %v369_v22, %v383_v12  ;;  %v392_v34 = vcombine.low %v388_v33, %v389_v17  ;;  %vm410_vm3 = vcmp.lt.s32.totalorder %v75_v23, 256 }
  0xe7   :  { %v415_v27 = vcombine.low %v390_v2, %v391_v26  ;;  %s575_s13 = smov [#allocation4]   ;;  %s576_s15 = smov [#allocation6]  }
  0xe8   :  { %v399_v36 = vrot.slane %v392_v34, %v398_v31  ;;  %s449_s14 = sshll.u32 %s575_s13, 4  ;;  %s459_s16 = sshll.u32 %s576_s15, 4  ;;  %s450_s14 = int_to_ptr.vmem [resolvable:$true] %s449_s14  ;;  %s460_s16 = int_to_ptr.vmem [resolvable:$true] %s459_s16 }
  0xe9   :  { %v422_v19 = vrot.slane %v415_v27, %v398_v31  ;;  %s521_s5 = scalar_lea.vmem %s450_s14, 32  ;;  %p526_p9 = scmp.lt.s32.totalorder %s450_s14, %s450_s14 }
  0xea   :  { %v400_v37 = vcombine.high %v399_v36, %v399_v36  ;;  %p522_p8 = scmp.ne.s32.totalorder %s450_s14, %s521_s5  ;;  %p527_p10 = scmp.lt.s32.totalorder %s521_s5, %s521_s5 }
  0xeb   :  { %v423_v38 = vcombine.high %v422_v19, %v422_v19 }
  0xec   :  { %v407_v39 = vrot.slane %v400_v37, %v398_v31  ;;  %p528_p11 = por %p527_p10, %p526_p9 }
  0xed   :  { %v430_v40 = vrot.slane %v423_v38, %v398_v31 }
  0xee   :  { %412 = vst.msk [vmem:[#allocation4] sm:$0x3] %vm410_vm3, %v407_v39  ;;  %p529_p12 = pnand %p528_p11, %p522_p8 }
  0xef   :  { %432 = vst.msk [vmem:[#allocation6] sm:$0x3] %vm410_vm3, %v430_v40 }
  0xf0   :  { %532 = shalt.err (!%p529_p12)
}
  0xf1   :  { %s533_s2 = scalar_lea.hbm %s738_s6, 32 }
  0xf2   :  { %p534_p13 = scmp.ne.s32.totalorder %s738_s6, %s533_s2  ;;  %p537_p0 = scmp.lt.u32.totalorder %s533_s2, %s738_s6 }
  0xf4   :  { %p539_p1 = pnand %p537_p0, %p534_p13 }
  0xf6   :  { %542 = shalt.err (!%p539_p1)
}
  0xf7   :  { %452 = dma.vmem_to_hbm [thread:$0]  %s450_s14, 32, %s738_s6, [#allocation5]  }
  0xf8   :  { %s543_s24 = scalar_lea.vmem %s460_s16, 32  ;;  %p548_p3 = scmp.lt.s32.totalorder %s460_s16, %s460_s16 }
  0xf9   :  { %p544_p2 = scmp.ne.s32.totalorder %s460_s16, %s543_s24  ;;  %p549_p4 = scmp.lt.s32.totalorder %s543_s24, %s543_s24 }
  0xfb   :  { %p550_p5 = por %p549_p4, %p548_p3 }
  0xfd   :  { %p551_p6 = pnand %p550_p5, %p544_p2 }
  0xff   :  { %554 = shalt.err (!%p551_p6)
}
 0x100   :  { %s555_s0 = scalar_lea.hbm %s739_s7, 32 }
 0x101   :  { %p556_p7 = scmp.ne.s32.totalorder %s739_s7, %s555_s0  ;;  %p559_p8 = scmp.lt.u32.totalorder %s555_s0, %s739_s7 }
 0x103   :  { %p561_p9 = pnand %p559_p8, %p556_p7 }
 0x105   :  { %564 = shalt.err (!%p561_p9)
}
 0x106   :  { %462 = dma.vmem_to_hbm [thread:$0]  %s460_s16, 32, %s739_s7, [#allocation5]  }
 0x107   :  { %565 = dma.done.wait [#allocation3], 64  }
 0x108   :  { %566 = vsyncadd [#allocation3], 4294967232 }
 0x109   :  { %567 = dma.done.wait [#allocation5], 64  }
 0x10a   :  { %568 = vsyncadd [#allocation5], 4294967232 }
 0x10b   :  { %472 = vsyncpa [#allocation3], 1 }
 0x10c   :  { %473 = vsyncpa [#allocation5], 1 }

</bundles_post_ra>
